<compile_context>
chip_gen: v7x
topology: tpu7x:2x2x1
jax: 0.10.0
libtpu: 0.0.40
codegen_flags: <defaults>
</compile_context>

<pallas_src>
import jax
import jax.numpy as jnp
from jax.experimental import pallas as pl
from jax.experimental.pallas import tpu as pltpu


# ----------------------------- helpers --------------------------------------


def _cdiv(a, b):
    return (a + b - 1) // b


def _round_up(x, m):
    return ((x + m - 1) // m) * m


def _sublane(dtype):
    # Sub-32-bit dtypes pack along sublanes: 8 rows for 32-bit, 16 for bf16,
    # 32 for int8/fp8.
    bits = jnp.dtype(dtype).itemsize * 8
    return max(8, 256 // bits)


def _vmem_capacity_bytes():
    # Generation-aware VMEM size (v5e/v6e: 128 MiB, v7x: 64 MiB per TC).
    try:
        info = pltpu.get_tpu_info()
        cap = int(getattr(info, "vmem_capacity_bytes", 0) or 0)
        if cap > 0:
            return cap
    except Exception:
        pass
    return 64 * 2**20  # conservative fallback (v7x-sized)


def _dot_nt(x, w):
    # x: (tm, tk), w: (tn, tk) -> (tm, tn); contract the last dim of both
    # operands (i.e. x @ w.T without materializing the transpose).
    return jax.lax.dot_general(
        x, w,
        dimension_numbers=(((1,), (1,)), ((), ())),
        preferred_element_type=jnp.float32,
    )


# ----------------------------- kernels ---------------------------------------


def _vl_kernel_single(x_ref, w_ref, o_ref):
    # Whole contraction dim in one tile: a single MXU dot per output block.
    o_ref[...] = _dot_nt(x_ref[...], w_ref[...]).astype(o_ref.dtype)


def _vl_kernel_ksplit_f32(x_ref, w_ref, o_ref):
    # K-reduction, f32 output: accumulate directly into the resident output
    # block (out_spec ignores k, so the block stays in VMEM across the k axis).
    @pl.when(pl.program_id(2) == 0)
    def _():
        o_ref[...] = jnp.zeros_like(o_ref)

    o_ref[...] += _dot_nt(x_ref[...], w_ref[...])


def _vl_kernel_ksplit_acc(x_ref, w_ref, o_ref, acc_ref):
    # K-reduction, narrow output dtype: f32 scratch accumulator, cast at end.
    @pl.when(pl.program_id(2) == 0)
    def _():
        acc_ref[...] = jnp.zeros_like(acc_ref)

    acc_ref[...] += _dot_nt(x_ref[...], w_ref[...])

    @pl.when(pl.program_id(2) == pl.num_programs(2) - 1)
    def _():
        o_ref[...] = acc_ref[...].astype(o_ref.dtype)


# ----------------------------- wrapper ----------------------------------------


def varlinear_forward(data, var, *, tm=None, tn=None, tk=None):
    """data: (..., H), var: (V, H)  ->  (..., V) == data @ var.T"""
    assert data.ndim > 1, "data should be at least 2 dimensional"
    assert data.shape[-1] == var.shape[-1]
    H = data.shape[-1]
    V = var.shape[0]
    lead = data.shape[:-1]

    x = data.reshape(-1, H)
    M = x.shape[0]
    out_dtype = jnp.result_type(data.dtype, var.dtype)
    x_item = jnp.dtype(x.dtype).itemsize
    w_item = jnp.dtype(var.dtype).itemsize
    o_item = jnp.dtype(out_dtype).itemsize

    vmem_cap = _vmem_capacity_bytes()
    big_vmem = vmem_cap >= 96 * 2**20  # v5e/v6e (128 MiB) vs v7x (64 MiB)

    # Large row tile: weight tile is re-fetched once per M row-tile, so a big
    # tm cuts weight HBM traffic.  Grow further when the part has 128 MiB VMEM.
    if tm is None:
        tm = 1024 if big_vmem else 512
    if tn is None:
        tn = 512
    if tk is None:
        tk = 1024

    sub_m = max(_sublane(x.dtype), _sublane(out_dtype))

    # --- K (contraction) axis: lane-align, split only if it doesn't fit -----
    Kp = _round_up(H, 128)  # lane-dense, full-depth MXU feeds
    if Kp <= tk:
        tk = Kp
        k_split = False
    else:
        nk = _cdiv(Kp, tk)
        tk = _round_up(_cdiv(Kp, nk), 128)
        Kp = _round_up(Kp, tk)
        k_split = True

    # Zero-pad ONLY the contraction axis (keeps accumulation exact).  M and V
    # use ragged boundary blocks handled by Pallas -> no extra HBM pass over
    # the (V, H) weight for non-aligned vocab sizes.
    if Kp != H:
        x = jnp.pad(x, ((0, 0), (0, Kp - H)))
        w = jnp.pad(var, ((0, 0), (0, Kp - H)))
    else:
        w = var

    # --- balanced M/V tiles ---------------------------------------------------
    def fit(dim, tmax, align):
        if dim <= tmax:
            return dim  # full extent is always a legal block dim
        n = _cdiv(dim, tmax)
        return _round_up(_cdiv(dim, n), align)

    tm = fit(M, tm, sub_m)
    tn = fit(V, tn, 128)

    # v7x has 2 TensorCores: make sure at least one "parallel" grid axis has
    # >= 2 blocks so both cores get work (negligible cost on 1-TC parts).
    if _cdiv(M, tm) == 1 and _cdiv(V, tn) == 1:
        if V >= 256:
            tn = _round_up(_cdiv(V, 2), 128)
        elif M >= 2 * sub_m:
            tm = _round_up(_cdiv(M, 2), sub_m)

    nm = _cdiv(M, tm)
    nn = _cdiv(V, tn)

    # --- grid / specs ---------------------------------------------------------
    if not k_split:
        grid = (nm, nn)
        in_specs = [
            pl.BlockSpec((tm, tk), lambda i, j: (i, 0)),
            pl.BlockSpec((tn, tk), lambda i, j: (j, 0)),
        ]
        out_specs = pl.BlockSpec((tm, tn), lambda i, j: (i, j))
        scratch_shapes = []
        kernel = _vl_kernel_single
        dim_sem = ("parallel", "parallel")
        extra_w_bufs = 0
    else:
        grid = (nm, nn, Kp // tk)
        in_specs = [
            pl.BlockSpec((tm, tk), lambda i, j, k: (i, k)),
            # Weight block changes every inner step and is the largest
            # per-step transfer: triple-buffer it to hide DMA behind the dot.
            pl.BlockSpec((tn, tk), lambda i, j, k: (j, k),
                         pipeline_mode=pl.Buffered(3)),
        ]
        out_specs = pl.BlockSpec((tm, tn), lambda i, j, k: (i, j))
        dim_sem = ("parallel", "parallel", "arbitrary")
        extra_w_bufs = 1
        if out_dtype == jnp.float32:
            scratch_shapes = []
            kernel = _vl_kernel_ksplit_f32
        else:
            scratch_shapes = [pltpu.VMEM((tm, tn), jnp.float32)]
            kernel = _vl_kernel_ksplit_acc

    # --- VMEM budget (generation-aware cap, always covers the tile budget) ----
    tile_bytes = (2 * tm * tk * x_item
                  + (2 + extra_w_bufs) * tn * tk * w_item
                  + 2 * tm * tn * o_item)
    if scratch_shapes:
        tile_bytes += tm * tn * 4
    vmem_limit = int(min(0.75 * vmem_cap,
                         max(32 * 2**20, tile_bytes + 8 * 2**20)))
    vmem_limit = int(min(max(vmem_limit, tile_bytes + 2 * 2**20), vmem_cap))

    # --- cost estimate reflecting actual re-read factors -----------------------
    cost = pl.CostEstimate(
        flops=2 * M * Kp * V,
        transcendentals=0,
        bytes_accessed=(
            M * Kp * x_item * (nn if k_split else 1)  # x re-read per N tile if K split
            + V * Kp * w_item * nm                    # weight re-read per M row-tile
            + M * V * o_item),
    )

    out = pl.pallas_call(
        kernel,
        out_shape=jax.ShapeDtypeStruct((M, V), out_dtype),
        grid_spec=pltpu.PrefetchScalarGridSpec(
            num_scalar_prefetch=0,
            grid=grid,
            in_specs=in_specs,
            out_specs=out_specs,
            scratch_shapes=scratch_shapes,
        ),
        compiler_params=pltpu.CompilerParams(
            dimension_semantics=dim_sem,
            vmem_limit_bytes=vmem_limit,
        ),
        cost_estimate=cost,
    )(x, w)

    return out.reshape(*lead, V)


# ------------------------ word_representer stand-in ---------------------------


def make_word_representer(key, vocab_size, hidden):
    """Deterministic stand-in for the external word_representer module:
    returns a callable producing a (V, H) matrix of word representations."""
    var = jax.random.normal(key, (vocab_size, hidden), dtype=jnp.float32) * 0.1

    def word_representer():
        return var

    return word_representer


if __name__ == "__main__":
    key = jax.random.PRNGKey(0)
    k_data, k_var = jax.random.split(key)

    B, S, H, V = 2, 8, 32, 128
    data = jax.random.normal(k_data, (B, S, H), dtype=jnp.float32)

    word_representer = make_word_representer(k_var, V, H)
    var = word_representer()  # (V, H), as in VarLinear.matmul

    fwd = jax.jit(varlinear_forward)
    out = jax.block_until_ready(fwd(data, var))

    # Reference check against plain JAX (torch.matmul(data, var.T) semantics).
    ref = jnp.matmul(data, var.T)
    assert out.shape == (B, S, V), out.shape
    assert jnp.allclose(out, ref, atol=1e-5, rtol=1e-5)

    print("KERNEL_OK")
</pallas_src>

<mosaic_0001>
module attributes {stable_mosaic.version = 11 : i64} {
  func.func @_vl_kernel_single(%arg0: i32, %arg1: i32, %arg2: memref<8x128xf32, #tpu.memory_space<vmem>>, %arg3: memref<128x128xf32, #tpu.memory_space<vmem>>, %arg4: memref<8x128xf32, #tpu.memory_space<vmem>>) attributes {dimension_semantics = [#tpu.dimension_semantics<parallel>, #tpu.dimension_semantics<parallel>], iteration_bounds = array<i64: 2, 1>, scalar_prefetch = 0 : i64, scratch_operands = 0 : i64, tpu.core_type = #tpu.core_type<tc>, window_params = [{transform_indices = @transform_0, window_bounds = array<i64: 8, 128>}, {transform_indices = @transform_1, window_bounds = array<i64: 128, 128>}, {transform_indices = @transform_2, window_bounds = array<i64: 8, 128>}]} {
    %c0 = arith.constant 0 : index
    %c0_0 = arith.constant 0 : index
    %0 = vector.load %arg2[%c0, %c0_0] : memref<8x128xf32, #tpu.memory_space<vmem>>, vector<8x128xf32>
    %c0_1 = arith.constant 0 : index
    %c0_2 = arith.constant 0 : index
    %1 = vector.load %arg3[%c0_1, %c0_2] : memref<128x128xf32, #tpu.memory_space<vmem>>, vector<128x128xf32>
    %cst = arith.constant dense<0.000000e+00> : vector<8x128xf32>
    %2 = tpu.matmul %0, %1, %cst {dimension_numbers = #tpu.dot_dimension_numbers<[1], [1], [0], [0], [0, 0, 1, 0], [], []>} : vector<8x128xf32>, vector<128x128xf32>, vector<8x128xf32> -> vector<8x128xf32>
    %c0_3 = arith.constant 0 : index
    %c0_4 = arith.constant 0 : index
    %3 = vector.load %arg4[%c0_3, %c0_4] : memref<8x128xf32, #tpu.memory_space<vmem>>, vector<8x128xf32>
    tpu.vector_store %arg4[%c0_3, %c0_4], %2 {strides = array<i32>} : memref<8x128xf32, #tpu.memory_space<vmem>>, vector<8x128xf32>,
    return
  }
  func.func @transform_0(%arg0: i32, %arg1: i32) -> (i32, i32) {
    %c0_i32 = arith.constant 0 : i32
    %c0_i32_0 = arith.constant 0 : i32
    return %arg0, %c0_i32 : i32, i32
  }
  func.func @transform_1(%arg0: i32, %arg1: i32) -> (i32, i32) {
    %c0_i32 = arith.constant 0 : i32
    %c0_i32_0 = arith.constant 0 : i32
    return %arg1, %c0_i32 : i32, i32
  }
  func.func @transform_2(%arg0: i32, %arg1: i32) -> (i32, i32) {
    %c0_i32 = arith.constant 0 : i32
    return %arg0, %arg1 : i32, i32
  }
}

</mosaic_0001>

<bundles_post_ra>
// kernel: varlinear_forward.1
= control target key start
LH: loop header
LB: loop body
LE: loop exit
PB: predicated region body
PF: predicated region fallthrough
CT: control target
= control target key end

     0   :  { %7 = vsyncpa [#allocation3], 0  ;;  %s766_s0 = inlined_call_operand.vmem [shape: f32[16,128], index: 0, kind: input, shape index: {}]   ;;  %s767_s1 = inlined_call_operand.vmem [shape: f32[128,128], index: 1, kind: input, shape index: {}]   ;;  %s768_s2 = inlined_call_operand.hbm [shape: f32[16,128], index: 2, kind: output, shape index: {}]  }
   0x1   :  { %9 = vsyncpa [#allocation3 + $0x1], 0  ;;  %s606_s9 = smov 0   ;;  %s608_s10 = smov 0  }
   0x2   :  { %s610_s11 = smov 0   ;;  %s612_s12 = smov 0  }
   0x3   :  { %s614_s13 = smov 0   ;;  %s616_s14 = smov 0  }
   0x4 LB: > { %s361_s15 = sadd.s32 4294967295, %s585_s14   ;;  %s362_s16 = sadd.s32 4294967294, %s585_s14   ;;  %s585_s14 = sphi %s616_s14, %s15_s14   ;;  %s581_s13 = sphi %s614_s13, %s775_s13   ;;  %s577_s12 = sphi %s612_s12, %s774_s12   ;;  %s573_s11 = sphi %s610_s11, %s773_s11   ;;  %s569_s10 = sphi %s608_s10, %s772_s10   ;;  %s565_s9 = sphi %s606_s9, %s771_s9  }
   0x5   : > { %s27_s17 = sadd.s32 1, %s581_s13  ;;  %s88_s18 = sadd.s32 1, %s573_s11 }
   0x6   : > { %p29_p0 = scmp.ge.s32.totalorder %s27_s17, 2  ;;  %p98_p1 = scmp.ne.s32.totalorder %s573_s11, %s569_s10 }
   0x7   : > { %p99_p2 = scmp.eq.s32.totalorder %s361_s15, 1  ;;  %p104_p3 = scmp.ne.s32.totalorder %s569_s10, %s565_s9 }
   0x8   : > { %s777_s17 = smov (%p29_p0, %s27_s17), 0  ;;  %p105_p5 = scmp.eq.s32.totalorder %s362_s16, 1 }
   0x9   : > { %p646_p4 = por %p99_p2, %p98_p1  ;;  %s83_s20 = ssub.s32 %s581_s13, %s777_s17 }
   0xa   : > { %p366_p6 = scmp.ge.s32.totalorder %s585_s14, 1  ;;  %p86_p7 = scmp.eq.s32.totalorder %s83_s20, 0 }
   0xb   : > { %p653_p8 = por %p105_p5, %p104_p3  ;;  %p139_p9 = scmp.lt.s32.totalorder %s585_s14, 3 }
   0xc   : > { %s659_s22 = scalar_select %p86_p7, %s573_s11, %s88_s18  }
   0xd   : > { %p140_p10 = pnand %p366_p6, %p139_p9 }
   0xe   : > { %v176_v0 = vld [vmem:[%s767_s1] sm:$0xff] (!%p140_p10)  ;;  %v177_v1 = vld [vmem:[%s767_s1 + $0x8] sm:$0xff] (!%p140_p10)  ;;  %v587_v2 = vmov (!%p140_p10), 0.0|0.0   ;;  %vm588_vm0 = vmmov (!%p140_p10), 0   ;;  %v589_v4 = vmov (!%p140_p10), 0.0   ;;  %v178_v5 = vld [vmem:[%s767_s1 + $0x10] sm:$0xff] (!%p140_p10) }
   0xf   : > { %143 = sbr.rel (%p140_p10) target bundleno = 306 (0x132), region = 28  ;;  %425 = vmatprep.subr.bf16.mxu0 (!%p140_p10), %v587_v2  ;;  %v426_v3 = vpack.c.bf16 (!%p140_p10), %v177_v1, %v176_v0  ;;  %422 = vmatprep.mubr.msk.f32.mxu0 (!%p140_p10), %vm588_vm0, %v589_v4  ;;  %v179_v6 = vld [vmem:[%s767_s1 + $0x18] sm:$0xff] (!%p140_p10)  ;;  %v180_v8 = vld [vmem:[%s767_s1 + $0x20] sm:$0xff] (!%p140_p10)  ;;  %v181_v9 = vld [vmem:[%s767_s1 + $0x28] sm:$0xff] (!%p140_p10)  ;;  %p165_p11 = scmp.lt.s32.totalorder (!%p140_p10), %s577_s12, 1 }
  0x10   : > { %v429_v7 = vpack.c.bf16 (!%p140_p10), %v179_v6, %v178_v5  ;;  %v432_v10 = vpack.c.bf16 (!%p140_p10), %v181_v9, %v180_v8  ;;  %v182_v11 = vld [vmem:[%s767_s1 + $0x30] sm:$0xff] (!%p140_p10)  ;;  %v183_v12 = vld [vmem:[%s767_s1 + $0x38] sm:$0xff] (!%p140_p10)  ;;  %v184_v14 = vld [vmem:[%s767_s1 + $0x40] sm:$0xff] (!%p140_p10)  ;;  %s162_s24 = sand.u32 (!%p140_p10), 1, %s569_s10   ;;  %s370_s28 = sshll.u32 (!%p140_p10), %s577_s12, 7 }
  0x11   : > { %427 = vmatpush3.bf16.xpose.msra.mxu0 (!%p140_p10), %v426_v3  ;;  %v435_v13 = vpack.c.bf16 (!%p140_p10), %v183_v12, %v182_v11  ;;  %v185_v15 = vld [vmem:[%s767_s1 + $0x48] sm:$0xff] (!%p140_p10)  ;;  %v186_v17 = vld [vmem:[%s767_s1 + $0x50] sm:$0xff] (!%p140_p10)  ;;  %v187_v18 = vld [vmem:[%s767_s1 + $0x58] sm:$0xff] (!%p140_p10)  ;;  %s367_s25 = sshll.u32 (!%p140_p10), %s162_s24, 3  ;;  %s721_s3 = scalar_lea.hbm (!%p140_p10), %s768_s2, %s370_s28 }
  0x12   : > { %428 = vmatprep.subr.bf16.mxu0 (!%p140_p10), %v587_v2  ;;  %v438_v16 = vpack.c.bf16 (!%p140_p10), %v185_v15, %v184_v14  ;;  %v441_v19 = vpack.c.bf16 (!%p140_p10), %v187_v18, %v186_v17  ;;  %v188_v20 = vld [vmem:[%s767_s1 + $0x60] sm:$0xff] (!%p140_p10)  ;;  %v189_v21 = vld [vmem:[%s767_s1 + $0x68] sm:$0xff] (!%p140_p10)  ;;  %v190_v23 = vld [vmem:[%s767_s1 + $0x70] sm:$0xff] (!%p140_p10)  ;;  %s164_s26 = scalar_lea.vmem (!%p140_p10), [#allocation2], %s367_s25  ;;  %s264_s4 = scalar_lea.sflag (!%p140_p10), [#allocation3], %s162_s24 }
  0x13   : > { %v444_v22 = vpack.c.bf16 (!%p140_p10), %v189_v21, %v188_v20  ;;  %v191_v24 = vld [vmem:[%s767_s1 + $0x78] sm:$0xff] (!%p140_p10)  ;;  %s278_s27 = sshll.u32 (!%p140_p10), %s164_s26, 4  ;;  %s716_s27 = int_to_ptr.vmem [resolvable:$true] %s278_s27 }
  0x14   : > { %v447_v25 = vpack.c.bf16 (!%p140_p10), %v191_v24, %v190_v23  ;;  %s507_s5 = scalar_lea.vmem (!%p140_p10), %s716_s27, 128 }
  0x15   : > { %p508_p12 = scmp.ne.s32.totalorder (!%p140_p10), %s716_s27, %s507_s5 }
  0x16   : > { %s166_s15 = scalar_select %p165_p11, %s577_s12, 1 }
  0x17   : > { %p509_p13 = pnand %p508_p12, %p646_p4  ;;  %s590_s12 = smov [#allocation2]  }
  0x18   : > { %s368_s16 = sshll.u32 %s166_s15, 3  ;;  %s511_s6 = sshll.u32 %s590_s12, 4  ;;  %s512_s6 = int_to_ptr.vmem [resolvable:$false] %s511_s6 }
  0x19   : > { %430 = vmatpush3.bf16.xpose.msra.mxu0 %v429_v7  ;;  %s168_s23 = scalar_lea.vmem %s766_s0, %s368_s16  ;;  %p510_p0 = pneg %p509_p13 }
  0x1a   : > { %431 = vmatprep.subr.bf16.mxu0 %v587_v2  ;;  %v175_v26 = vld [vmem:[%s168_s23] sm:$0xff]  ;;  %s513_s7 = scalar_lea.vmem %s512_s6, 256  ;;  %p514_p1 = scmp.lt.s32.totalorder %s716_s27, %s512_s6 }
  0x1b   : > { %p515_p2 = scmp.lt.s32.totalorder %s513_s7, %s507_s5 }
  0x1d   : > { %p516_p3 = por %p515_p2, %p514_p1 }
  0x1f   : > { %p517_p5 = pnand %p516_p3, %p510_p0 }
  0x21   : > { %433 = vmatpush3.bf16.xpose.msra.mxu0 %v432_v10 }
  0x22   : > { %434 = vmatprep.subr.bf16.mxu0 %v587_v2 }
  0x29   : > { %436 = vmatpush3.bf16.xpose.msra.mxu0 %v435_v13 }
  0x2a   : > { %437 = vmatprep.subr.bf16.mxu0 %v587_v2 }
  0x31   : > { %439 = vmatpush3.bf16.xpose.msra.mxu0 %v438_v16 }
  0x32   : > { %440 = vmatprep.subr.bf16.mxu0 %v587_v2 }
  0x39   : > { %442 = vmatpush3.bf16.xpose.msra.mxu0 %v441_v19 }
  0x3a   : > { %443 = vmatprep.subr.bf16.mxu0 %v587_v2 }
  0x41   : > { %445 = vmatpush3.bf16.xpose.msra.mxu0 %v444_v22 }
  0x42   : > { %446 = vmatprep.subr.bf16.mxu0 %v587_v2 }
  0x49   : > { %448 = vmatpush3.bf16.xpose.msra.mxu0 %v447_v25 }
  0x50   : > { %423 = vmatmul.mubr.f32.vlgmr.msra.gmra.mrb[0].mxu0 %v175_v26 }
 0x123   : > { %v258_v27 = vpop.f32.mrb[0].mxu0 }
 0x124   : > { %262 = vst [vmem:[%s164_s26] sm:$0xff] %v258_v27  ;;  %v424_v28 = vpop.f32.mrb[1].mxu0 }
 0x125   : > { %520 = shalt.err (!%p517_p5)
}
 0x126   : > { %s521_s8 = scalar_lea.hbm %s721_s3, 128  ;;  %s525_s18 = scalar_lea.hbm %s768_s2, 256 }
 0x127   : > { %p522_p6 = scmp.ne.s32.totalorder %s721_s3, %s521_s8  ;;  %p526_p10 = scmp.lt.u32.totalorder %s721_s3, %s768_s2 }
 0x128   : > { %p527_p11 = scmp.lt.u32.totalorder %s525_s18, %s521_s8  ;;  %p529_p13 = scmp.lt.u32.totalorder %s521_s8, %s721_s3 }
 0x129   : > { %p523_p7 = pnand %p522_p6, %p646_p4 }
 0x12a   : > { %p528_p12 = por %p527_p11, %p526_p10 }
 0x12b   : > { %p524_p9 = pneg %p523_p7 }
 0x12c   : > { %p530_p0 = por %p529_p13, %p528_p12 }
 0x12e   : > { %p531_p1 = pnand %p530_p0, %p524_p9 }
 0x130   : > { %534 = shalt.err (!%p531_p1)
}
 0x131   : > { %449 = dma.vmem_to_hbm [thread:$0]  (%p646_p4), %s716_s27, 128, %s721_s3, %s264_s4  }
 0x132 PF: > { %p455_p2 = scmp.ge.s32.totalorder %s585_s14, 2  ;;  %s290_s24 = sand.u32 1, %s565_s9  }
 0x133   : > { %s291_s25 = scalar_lea.sflag [#allocation3], %s290_s24 }
 0x134   : > { %p452_p3 = pnand %p455_p2, %p653_p8 }
 0x136   : > { %560 = dma.done.wait (!%p452_p3), %s291_s25, 128  }
 0x137   : > { %562 = vsyncadd (!%p452_p3), %s291_s25, 4294967168  ;;  %s15_s14 = sadd.s32 1, %s585_s14   ;;  %s771_s9 = smov %s569_s10 }
 0x138   : > { %p12_p5 = scmp.ge.s32.totalorder %s15_s14, 4   ;;  %s772_s10 = smov %s573_s11 }
 0x139   : > { %s773_s11 = smov %s659_s22  ;;  %s774_s12 = smov %s581_s13 }
 0x13a   : > { %s775_s13 = smov %s777_s17  ;;  %14 = sbr.rel (!%p12_p5) target bundleno = 4 (0x4), region = 66 }
 0x141   :  { %296 = vsyncpa [#allocation3], 1 }
 0x142   :  { %298 = vsyncpa [#allocation3 + $0x1], 1 }

</bundles_post_ra>
